<compile_context>
chip_gen: v5e
topology: v5e:2x2
jax: 0.10.0
libtpu: 0.0.40
codegen_flags: <defaults>
</compile_context>

<pallas_src>
import math

import numpy as np

import jax
import jax.numpy as jnp
from jax.experimental import pallas as pl
from jax.experimental.pallas import tpu as pltpu


# ----------------------------------------------------------------------------
# Host-side helpers: PyTorch-compatible separable interpolation matrices.
# ----------------------------------------------------------------------------
def _axis_weight_matrix(in_size, out_size, mode, align_corners, scale_factor):
    """Build M of shape (out_size, in_size) so that  out = M @ in  along one
    spatial axis, matching F.interpolate (recompute_scale_factor=False)."""
    m = np.zeros((out_size, in_size), dtype=np.float32)
    if mode == "nearest":
        step = (1.0 / scale_factor) if scale_factor is not None else in_size / out_size
        for d in range(out_size):
            s = min(int(math.floor(d * step)), in_size - 1)
            m[d, s] = 1.0
    elif mode == "bilinear":
        if align_corners:
            step = (in_size - 1) / (out_size - 1) if out_size > 1 else 0.0
            for d in range(out_size):
                src = d * step
                lo = min(int(math.floor(src)), in_size - 1)
                hi = min(lo + 1, in_size - 1)
                t = src - lo
                m[d, lo] += 1.0 - t
                m[d, hi] += t
        else:
            step = (1.0 / scale_factor) if scale_factor is not None else in_size / out_size
            for d in range(out_size):
                src = max(step * (d + 0.5) - 0.5, 0.0)
                lo = min(int(math.floor(src)), in_size - 1)
                hi = min(lo + 1, in_size - 1)
                t = src - lo
                m[d, lo] += 1.0 - t
                m[d, hi] += t
    else:
        # TODO(synk): 'bicubic' (non-separable 4-tap) and 1D/3D ('linear',
        # 'trilinear') modes are not implemented in this 2D kernel.
        raise NotImplementedError(f"mode={mode!r} not supported")
    return m


def _resolve_output_size(h_in, w_in, size, scale_factor):
    if (size is None) == (scale_factor is None):
        raise ValueError("exactly one of `size` / `scale_factor` must be given")
    if size is not None:
        h_out, w_out = (size, size) if isinstance(size, int) else tuple(size)
        return int(h_out), int(w_out), None, None
    if isinstance(scale_factor, (tuple, list)):
        sf_h, sf_w = float(scale_factor[0]), float(scale_factor[1])
    else:
        sf_h = sf_w = float(scale_factor)
    return int(math.floor(h_in * sf_h)), int(math.floor(w_in * sf_w)), sf_h, sf_w


def _build_matrices(h_in, w_in, size, scale_factor, mode, align_corners):
    h_out, w_out, sf_h, sf_w = _resolve_output_size(h_in, w_in, size, scale_factor)
    ac = None if mode == "nearest" else bool(align_corners)
    r = _axis_weight_matrix(h_in, h_out, mode, ac, sf_h)          # (Ho, Hi)
    c = _axis_weight_matrix(w_in, w_out, mode, ac, sf_w).T        # (Wi, Wo)
    return h_out, w_out, jnp.asarray(r), jnp.asarray(np.ascontiguousarray(c))


# ----------------------------------------------------------------------------
# Pallas kernel: one grid step == one (image, channel) plane.
#   x_ref : (1, 1, Hi, Wi)   input plane (NCHW block)
#   r_ref : (Ho, Hi)         row interpolation matrix
#   c_ref : (Wi, Wo)         column interpolation matrix
#   o_ref : (1, 1, Ho, Wo)   output plane
# ----------------------------------------------------------------------------
def _interp2d_kernel(x_ref, r_ref, c_ref, o_ref):
    ho = o_ref.shape[2]
    wo = o_ref.shape[3]
    x = x_ref[0, 0].astype(jnp.float32)                            # (Hi, Wi)
    t = jnp.dot(r_ref[...], x, preferred_element_type=jnp.float32)  # (Ho, Wi)
    y = jnp.dot(t, c_ref[...], preferred_element_type=jnp.float32)  # (Ho, Wo)
    o_ref[...] = y.reshape(1, 1, ho, wo).astype(o_ref.dtype)


# ----------------------------------------------------------------------------
# Public wrapper: matches Interpolate2d.forward (NCHW in, NCHW out).
# ----------------------------------------------------------------------------
def interpolate2d(x, *, size=None, scale_factor=None, mode="nearest",
                  align_corners=False):
    n, c, h_in, w_in = x.shape
    h_out, w_out, rmat, cmat = _build_matrices(
        h_in, w_in, size, scale_factor, mode, align_corners)

    return pl.pallas_call(
        _interp2d_kernel,
        out_shape=jax.ShapeDtypeStruct((n, c, h_out, w_out), x.dtype),
        grid_spec=pltpu.PrefetchScalarGridSpec(
            num_scalar_prefetch=0,
            grid=(n, c),
            in_specs=[
                pl.BlockSpec((1, 1, h_in, w_in), lambda i, j: (i, j, 0, 0)),
                pl.BlockSpec((h_out, h_in), lambda i, j: (0, 0)),
                pl.BlockSpec((w_in, w_out), lambda i, j: (0, 0)),
            ],
            out_specs=pl.BlockSpec((1, 1, h_out, w_out),
                                   lambda i, j: (i, j, 0, 0)),
        ),
        compiler_params=pltpu.CompilerParams(
            dimension_semantics=("parallel", "parallel")),
    )(x, rmat, cmat)


# ----------------------------------------------------------------------------
if __name__ == "__main__":
    # Matches typical EfficientDet FPN usage: nearest, scale_factor=2, NCHW.
    N, C, H, W = 2, 4, 16, 16
    key = jax.random.PRNGKey(0)
    x = jax.random.normal(key, (N, C, H, W), dtype=jnp.float32)

    # --- nearest, scale_factor=2 (module defaults) ---------------------------
    out_nn = interpolate2d(x, scale_factor=2.0, mode="nearest")
    jax.block_until_ready(out_nn)
    assert out_nn.shape == (N, C, 2 * H, 2 * W), out_nn.shape
    ref_nn = jnp.repeat(jnp.repeat(x, 2, axis=2), 2, axis=3)   # exact for s=2
    assert jnp.allclose(out_nn, ref_nn, atol=1e-6), "nearest mismatch"

    # --- bilinear, explicit output size, align_corners=False -----------------
    Ho, Wo, rmat, cmat = _build_matrices(H, W, (24, 40), None, "bilinear", False)
    out_bl = interpolate2d(x, size=(24, 40), mode="bilinear", align_corners=False)
    jax.block_until_ready(out_bl)
    assert out_bl.shape == (N, C, 24, 40), out_bl.shape
    ref_bl = jnp.einsum("Hh,nchw,wW->ncHW", rmat, x, cmat)
    assert jnp.allclose(out_bl, ref_bl, atol=1e-4), "bilinear mismatch"

    print("KERNEL_OK")
</pallas_src>

<mosaic_0001>
module attributes {stable_mosaic.version = 11 : i64} {
  func.func @_interp2d_kernel(%arg0: i32, %arg1: i32, %arg2: memref<1x1x16x16xf32, #tpu.memory_space<vmem>>, %arg3: memref<32x16xf32, #tpu.memory_space<vmem>>, %arg4: memref<16x32xf32, #tpu.memory_space<vmem>>, %arg5: memref<1x1x32x32xf32, #tpu.memory_space<vmem>>) attributes {dimension_semantics = [#tpu.dimension_semantics<parallel>, #tpu.dimension_semantics<parallel>], iteration_bounds = array<i64: 2, 4>, scalar_prefetch = 0 : i64, scratch_operands = 0 : i64, tpu.core_type = #tpu.core_type<tc>, window_params = [{transform_indices = @transform_0, window_bounds = array<i64: 1, 1, 16, 16>}, {pipeline_mode = #tpu.pipeline_mode<synchronous>, transform_indices = @transform_1, window_bounds = array<i64: 32, 16>}, {pipeline_mode = #tpu.pipeline_mode<synchronous>, transform_indices = @transform_2, window_bounds = array<i64: 16, 32>}, {transform_indices = @transform_3, window_bounds = array<i64: 1, 1, 32, 32>}]} {
    %c0 = arith.constant 0 : index
    %c0_0 = arith.constant 0 : index
    %c0_1 = arith.constant 0 : index
    %c0_2 = arith.constant 0 : index
    %0 = vector.load %arg2[%c0, %c0_0, %c0_1, %c0_2] : memref<1x1x16x16xf32, #tpu.memory_space<vmem>>, vector<1x1x16x16xf32>
    %1 = vector.shape_cast %0 : vector<1x1x16x16xf32> to vector<16x16xf32>
    %c0_3 = arith.constant 0 : index
    %c0_4 = arith.constant 0 : index
    %2 = vector.load %arg3[%c0_3, %c0_4] : memref<32x16xf32, #tpu.memory_space<vmem>>, vector<32x16xf32>
    %cst = arith.constant dense<0.000000e+00> : vector<32x16xf32>
    %3 = tpu.matmul %2, %1, %cst {dimension_numbers = #tpu.dot_dimension_numbers<[1], [0], [0], [1], [0, 0, 1, 1], [], []>} : vector<32x16xf32>, vector<16x16xf32>, vector<32x16xf32> -> vector<32x16xf32>
    %c0_5 = arith.constant 0 : index
    %c0_6 = arith.constant 0 : index
    %4 = vector.load %arg4[%c0_5, %c0_6] : memref<16x32xf32, #tpu.memory_space<vmem>>, vector<16x32xf32>
    %cst_7 = arith.constant dense<0.000000e+00> : vector<32x32xf32>
    %5 = tpu.matmul %3, %4, %cst_7 {dimension_numbers = #tpu.dot_dimension_numbers<[1], [0], [0], [1], [0, 0, 1, 1], [], []>} : vector<32x16xf32>, vector<16x32xf32>, vector<32x32xf32> -> vector<32x32xf32>
    %6 = vector.shape_cast %5 : vector<32x32xf32> to vector<1x1x32x32xf32>
    %c0_8 = arith.constant 0 : index
    %c0_9 = arith.constant 0 : index
    %c0_10 = arith.constant 0 : index
    %c0_11 = arith.constant 0 : index
    %7 = vector.load %arg5[%c0_8, %c0_9, %c0_10, %c0_11] : memref<1x1x32x32xf32, #tpu.memory_space<vmem>>, vector<1x1x32x32xf32>
    tpu.vector_store %arg5[%c0_8, %c0_9, %c0_10, %c0_11], %6 {strides = array<i32>} : memref<1x1x32x32xf32, #tpu.memory_space<vmem>>, vector<1x1x32x32xf32>,
    return
  }
  func.func @transform_0(%arg0: i32, %arg1: i32) -> (i32, i32, i32, i32) {
    %c0_i32 = arith.constant 0 : i32
    %c0_i32_0 = arith.constant 0 : i32
    %c0_i32_1 = arith.constant 0 : i32
    return %arg0, %arg1, %c0_i32, %c0_i32_0 : i32, i32, i32, i32
  }
  func.func @transform_1(%arg0: i32, %arg1: i32) -> (i32, i32) {
    %c0_i32 = arith.constant 0 : i32
    %c0_i32_0 = arith.constant 0 : i32
    %c0_i32_1 = arith.constant 0 : i32
    return %c0_i32, %c0_i32_0 : i32, i32
  }
  func.func @transform_2(%arg0: i32, %arg1: i32) -> (i32, i32) {
    %c0_i32 = arith.constant 0 : i32
    %c0_i32_0 = arith.constant 0 : i32
    %c0_i32_1 = arith.constant 0 : i32
    return %c0_i32, %c0_i32_0 : i32, i32
  }
  func.func @transform_3(%arg0: i32, %arg1: i32) -> (i32, i32, i32, i32) {
    %c0_i32 = arith.constant 0 : i32
    %c0_i32_0 = arith.constant 0 : i32
    %c0_i32_1 = arith.constant 0 : i32
    return %arg0, %arg1, %c0_i32, %c0_i32_0 : i32, i32, i32, i32
  }
}

</mosaic_0001>

<bundles_post_ra>
// kernel: tpu_custom_call.1
= control target key start
LH: loop header
LB: loop body
LE: loop exit
PB: predicated region body
PF: predicated region fallthrough
CT: control target
= control target key end

     0   :  { %8 = vsyncpa [#allocation3], 0  ;;  %s851_s0 = inlined_call_operand.hbm [shape: f32[2,4,16,16], index: 0, kind: input, shape index: {}]   ;;  %s852_s1 = inlined_call_operand.vmem [shape: f32[32,16], index: 1, kind: input, shape index: {}]   ;;  %s853_s2 = inlined_call_operand.vmem [shape: f32[16,32], index: 2, kind: input, shape index: {}]   ;;  %s854_s3 = inlined_call_operand.hbm [shape: f32[2,4,32,32], index: 3, kind: output, shape index: {}]  }
   0x1   :  { %10 = vsyncpa [#allocation3 + $0x1], 0 }
   0x2   :  { %11 = vsyncpa [#allocation4], 0 }
   0x3   :  { %13 = vsyncpa [#allocation4 + $0x1], 0  ;;  %s678_s12 = smov 0   ;;  %s680_s13 = smov 0  }
   0x4   :  { %s682_s14 = smov 0   ;;  %s684_s15 = smov 0  }
   0x5   :  { %s686_s16 = smov 0   ;;  %s688_s17 = smov 0  }
   0x6   :  { %s690_s18 = smov 0   ;;  %s692_s19 = smov 0  }
   0x7 LB: > { %s413_s20 = sadd.s32 4294967295, %s652_s19   ;;  %s414_s21 = sadd.s32 4294967294, %s652_s19   ;;  %s652_s19 = sphi %s692_s19, %s19_s19   ;;  %s648_s18 = sphi %s690_s18, %s873_s18   ;;  %s644_s17 = sphi %s688_s17, %s872_s17   ;;  %s640_s16 = sphi %s686_s16, %s871_s16   ;;  %s636_s15 = sphi %s684_s15, %s870_s15   ;;  %s632_s14 = sphi %s682_s14, %s869_s14   ;;  %s628_s13 = sphi %s680_s13, %s868_s13   ;;  %s624_s12 = sphi %s678_s12, %s867_s12  }
   0x8   : > { %s28_s22 = sadd.s32 1, %s644_s17  ;;  %s31_s23 = sadd.s32 1, %s648_s18 }
   0x9   : > { %p29_p0 = scmp.ge.s32.totalorder %s28_s22, 4  ;;  %s40_s24 = sadd.s32 1, %s632_s14 }
   0xa   : > { %p47_p1 = scmp.ne.s32.totalorder %s632_s14, %s628_s13  ;;  %p48_p2 = scmp.eq.s32.totalorder %s652_s19, 0 }
   0xb   : > { %s875_s22 = smov (%p29_p0, %s28_s22), 0  ;;  %s877_s23 = smov (!%p29_p0, %s31_s23), %s648_s18 }
   0xc   : > { %857 = sst [smem:[#allocation8_spill]] %s875_s22  ;;  %s36_s25 = ssub.s32 %s644_s17, %s875_s22 }
   0xd   : > { %p731_p3 = por %p48_p2, %p47_p1  ;;  %p33_p4 = scmp.ge.s32.totalorder %s877_s23, 2 }
   0xe   : > { %p53_p5 = scmp.ne.s32.totalorder %s628_s13, %s624_s12  ;;  %p54_p6 = scmp.eq.s32.totalorder %s413_s20, 0 }
   0xf   : > { %p121_p7 = scmp.eq.s32.totalorder %s413_s20, 7  ;;  %s879_s23 = smov (%p33_p4, %s877_s23), 0 }
  0x10   : > { %859 = sst [smem:[#allocation9_spill]] %s879_s23  ;;  %p739_p8 = por %p54_p6, %p53_p5 }
  0x11   : > { %p743_p9 = por %p121_p7, %p47_p1  ;;  %s35_s29 = ssub.s32 %s648_s18, %s879_s23 }
  0x12   : > { %p127_p10 = scmp.eq.s32.totalorder %s414_s21, 7  ;;  %s37_s30 = sor.u32 %s36_s25, %s35_s29 }
  0x13   : > { %p38_p11 = scmp.eq.s32.totalorder %s37_s30, 0  ;;  %p454_p13 = scmp.lt.s32.totalorder %s652_s19, 8 }
  0x14   : > { %p749_p12 = por %p127_p10, %p53_p5  ;;  %s153_s5 = sand.u32 1, %s632_s14  }
  0x15   : > { %s756_s6 = scalar_select %p38_p11, %s632_s14, %s40_s24  }
  0x16   : > { %s417_s7 = sshll.u32 %s153_s5, 4  ;;  %s418_s8 = sshll.u32 %s644_s17, 1 }
  0x17   : > { %863 = sst [smem:[#allocation10_spill]] %s756_s6  ;;  %s419_s9 = sshll.u32 %s648_s18, 3 }
  0x18   : > { %s157_s10 = scalar_lea.vmem [#allocation2], %s417_s7  ;;  %s162_s20 = sadd.s32 %s419_s9, %s418_s8 }
  0x19   : > { %s167_s11 = sshll.u32 %s157_s10, 4  ;;  %s420_s21 = sshll.u32 %s162_s20, 3  ;;  %s168_s11 = int_to_ptr.vmem [resolvable:$true] %s167_s11 }
  0x1a   : > { %p447_p0 = pnand %p454_p13, %p731_p3  ;;  %s164_s30 = scalar_lea.hbm %s851_s0, %s420_s21 }
  0x1b   : > { %s165_s23 = sshll.u32 %s164_s30, 4  ;;  %s154_s24 = scalar_lea.sflag [#allocation3], %s153_s5  ;;  %s166_s23 = int_to_ptr.hbm [resolvable:$true] %s165_s23 }
  0x1c   : > { %s654_s22 = smov 128   ;;  %s655_s6 = smov 8  }
  0x1d   : > { %449 = dma.hbm_to_vmem [thread:$0]  (!%p447_p0), %s166_s23, 256, %s168_s11, %s154_s24, %s654_s22, %s654_s22, %s655_s6  }
  0x1e   : > { %p421_p1 = scmp.ge.s32.totalorder %s652_s19, 1  ;;  %p175_p2 = scmp.lt.s32.totalorder %s652_s19, 9 }
  0x20   : > { %p176_p4 = pnand %p421_p1, %p175_p2 }
  0x21   : > { %s768_s7 = sand.u32 (!%p176_p4), 1, %s628_s13  }
  0x22   : > { %179 = sbr.rel (%p176_p4) target bundleno = 320 (0x140), region = 32  ;;  %s422_s26 = sshll.u32 (!%p176_p4), %s768_s7, 4 }
  0x23   : > { %s182_s8 = scalar_lea.sflag (!%p176_p4), [#allocation3], %s768_s7  ;;  %s185_s9 = scalar_lea.vmem (!%p176_p4), [#allocation2], %s422_s26 }
  0x27   : > { %615 = dma.done.wait (%p739_p8), %s182_s8, 256  }
  0x28   : > { %617 = vsyncadd (%p739_p8), %s182_s8, 4294967040  ;;  %v210_v0 = vld [vmem:[%s185_s9 + $0x8] sm:$0xff]  ;;  %v209_v1 = vld [vmem:[%s185_s9] sm:$0xff]  ;;  %vm215_vm0 = vcmask 130048   ;;  %s423_s24 = sshll.u32 %s768_s7, 5  ;;  %vm300_vm1 = vcmask 261120  }
  0x29   : > { %438 = vmatpush.msra.mxu2 %v210_v0  ;;  %v213_v2 = vld [vmem:[%s852_s1 + $0x10] sm:$0xff]  ;;  %242 = vmatpush.msra.mxu0 %v210_v0  ;;  %v211_v3 = vld [vmem:[%s852_s1] sm:$0xff]  ;;  %v258_v4 = vld [vmem:[%s853_s2 + $0x8] sm:$0xff]  ;;  %s208_s26 = scalar_lea.vmem [#allocation5], %s423_s24  ;;  %s433_s8 = sshll.u32 %s636_s15, 2 }
  0x2a   : > { %440 = vmatpush.msra.mxu3 %v258_v4  ;;  %285 = vmatpush.msra.mxu1 %v258_v4  ;;  %v214_v5 = vld [vmem:[%s852_s1 + $0x18] sm:$0xff]  ;;  %v212_v6 = vld [vmem:[%s852_s1 + $0x8] sm:$0xff]  ;;  %v257_v7 = vld [vmem:[%s853_s2] sm:$0xff]  ;;  %s434_s9 = sshll.u32 %s640_s16, 4  ;;  %s320_s11 = sshll.u32 %s208_s26, 4  ;;  %s321_s11 = int_to_ptr.vmem [resolvable:$true] %s320_s11 }
  0x2b   : > { %439 = vmatpush.msra.mxu2 %v209_v1  ;;  %243 = vmatpush.msra.mxu0 %v209_v1  ;;  %s317_s22 = sadd.s32 %s434_s9, %s433_s8  ;;  %s306_s15 = scalar_lea.sflag [#allocation4], %s768_s7 }
  0x2c   : > { %426 = vmatmul.msk.f32.vlgmr.msra.gmra.mxu2 %vm215_vm0, %v213_v2  ;;  %424 = vmatmul.msk.f32.vlgmr.msra.gmra.mxu0 %vm215_vm0, %v211_v3  ;;  %s435_s23 = sshll.u32 %s317_s22, 3  ;;  %s574_s29 = scalar_lea.hbm %s854_s3, 256 }
  0x2d   : > { %441 = vmatpush.msra.mxu3 %v257_v7  ;;  %286 = vmatpush.msra.mxu1 %v257_v7  ;;  %s319_s10 = scalar_lea.hbm %s854_s3, %s435_s23 }
  0x2e   : > { %s322_s27 = sshll.u32 %s319_s10, 4  ;;  %s323_s27 = int_to_ptr.hbm [resolvable:$true] %s322_s27 }
  0x2f   : > { %s568_s16 = sshra.s32 %s323_s27, 4  ;;  %s569_s16 = int_to_ptr.hbm [resolvable:$true] %s568_s16 }
  0x30   : > { %s570_s20 = scalar_lea.hbm %s569_s16, 32  ;;  %p575_p7 = scmp.lt.s32.totalorder %s569_s16, %s854_s3 }
  0x31   : > { %p571_p3 = scmp.ne.s32.totalorder %s569_s16, %s570_s20  ;;  %p576_p8 = scmp.lt.s32.totalorder %s574_s29, %s570_s20 }
  0x33   : > { %p572_p5 = pnand %p571_p3, %p743_p9  ;;  %p577_p10 = por %p576_p8, %p575_p7 }
  0x34   : > { %427 = vmatmul.msk.f32.gmra.mxu2 %vm215_vm0, %v214_v5  ;;  %425 = vmatmul.msk.f32.gmra.mxu0 %vm215_vm0, %v212_v6 }
  0x35   : > { %p573_p6 = pneg %p572_p5 }
  0x37   : > { %p578_p11 = pnand %p577_p10, %p573_p6 }
  0xa9   : > { %v245_v8 = vpop.f32.mrf.mxu0 }
  0xaa   : > { %428 = vmatmul.msk.f32.vlgmr.msra.gmra.mxu1 %vm215_vm0, %v245_v8 }
  0xaf   : > { %v251_v9 = vpop.f32.mrf.mxu2 }
  0xb0   : > { %430 = vmatmul.msk.f32.vlgmr.msra.gmra.mxu3 %vm215_vm0, %v251_v9 }
  0xb1   : > { %v248_v10 = vpop.f32.mrf.mxu0 }
  0xb2   : > { %429 = vmatmul.msk.f32.gmra.mxu1 %vm215_vm0, %v248_v10 }
  0xb7   : > { %v254_v11 = vpop.f32.mrf.mxu2 }
  0xb8   : > { %431 = vmatmul.msk.f32.gmra.mxu3 %vm215_vm0, %v254_v11 }
 0x127   : > { %v288_v12 = vpop.f32.mrf.mxu1 }
 0x128   : > { %301 = vst.msk [vmem:[%s208_s26] sm:$0xff] %vm300_vm1, %v288_v12 }
 0x12f   : > { %v291_v13 = vpop.f32.mrf.mxu1 }
 0x130   : > { %302 = vst.msk [vmem:[%s208_s26 + $0x8] sm:$0xff] %vm300_vm1, %v291_v13 }
 0x133   : > { %v294_v14 = vpop.f32.mrf.mxu3 }
 0x134   : > { %303 = vst.msk [vmem:[%s208_s26 + $0x10] sm:$0xff] %vm300_vm1, %v294_v14 }
 0x13b   : > { %v297_v15 = vpop.f32.mrf.mxu3 }
 0x13c   : > { %304 = vst.msk [vmem:[%s208_s26 + $0x18] sm:$0xff] %vm300_vm1, %v297_v15 }
 0x13d   : > { %581 = shalt.err (!%p578_p11)
}
 0x13e   : > { %s656_s7 = smov 128   ;;  %s657_s26 = smov 8  }
 0x13f   : > { %444 = dma.vmem_to_hbm [thread:$0]  (%p743_p9), %s321_s11, 512, %s323_s27, %s306_s15, %s656_s7, %s656_s7, %s657_s26  }
 0x140 PF: > { %p455_p13 = scmp.ge.s32.totalorder %s652_s19, 2  ;;  %s337_s8 = sand.u32 1, %s624_s12  }
 0x141   : > { %s338_s9 = scalar_lea.sflag [#allocation4], %s337_s8 }
 0x142   : > { %p451_p0 = pnand %p455_p13, %p749_p12 }
 0x144   : > { %p452_p1 = pneg %p451_p0 }
 0x146   : > { %619 = dma.done.wait (%p452_p1), %s338_s9, 512  }
 0x147   : > { %621 = vsyncadd (%p452_p1), %s338_s9, 4294966784  ;;  %s19_s19 = sadd.s32 1, %s652_s19   ;;  %s864_s22 = sld [smem:[#allocation10_spill]] }
 0x148   : > { %p16_p2 = scmp.ge.s32.totalorder %s19_s19, 10   ;;  %s865_s28 = sld [smem:[#allocation8_spill]] }
 0x149   : > { %s866_s23 = sld [smem:[#allocation9_spill]]  ;;  %s867_s12 = smov %s628_s13 }
 0x14a   : > { %s868_s13 = smov %s632_s14  ;;  %s870_s15 = smov %s644_s17 }
 0x14b   : > { %s871_s16 = smov %s648_s18  ;;  %18 = sbr.rel (!%p16_p2) target bundleno = 7 (0x7), region = 77 }
 0x14d   : > { %s869_s14 = smov %s864_s22 }
 0x14e   : > { %s872_s17 = smov %s865_s28 }
 0x14f   : > { %s873_s18 = smov %s866_s23 }
 0x150   :  { %344 = vsyncpa [#allocation3], 1 }
 0x151   :  { %346 = vsyncpa [#allocation3 + $0x1], 1 }
 0x152   :  { %347 = vsyncpa [#allocation4], 1 }
 0x153   :  { %349 = vsyncpa [#allocation4 + $0x1], 1 }

</bundles_post_ra>
